<compile_context>
chip_gen: v6e
topology: v6e:2x2x1
jax: 0.10.0
libtpu: 0.0.40
codegen_flags: <defaults>
</compile_context>

<pallas_src>
import jax
import jax.numpy as jnp
from jax.experimental import pallas as pl
from jax.experimental.pallas import tpu as pltpu


def _mish_kernel(x_ref, o_ref):
    x = x_ref[...].astype(jnp.float32)  # f32 compute path (required on v5e EUP)
    # tanh(log1p(e^x)) == t*(t+2) / (t*(t+2) + 2), with t = e^x.
    t = jnp.exp(jnp.minimum(x, 20.0))           # guard exp overflow
    num = t * (t + 2.0)                          # <= ~2.4e17, safe in f32
    den = num + 2.0
    y = x * num * pl.reciprocal(den, approx=False)
    # Match torch.nn.functional.softplus threshold=20 semantics exactly.
    y = jnp.where(x > 20.0, x, y)
    o_ref[...] = y.astype(o_ref.dtype)


def _mish_jnp(x):
    """Same formulation in plain jnp (used only for the <128-element tail)."""
    xf = x.astype(jnp.float32)
    t = jnp.exp(jnp.minimum(xf, 20.0))
    num = t * (t + 2.0)
    y = xf * num / (num + 2.0)
    y = jnp.where(xf > 20.0, xf, y)
    return y.astype(x.dtype)


def mish_pallas(x: jax.Array) -> jax.Array:
    """Elementwise Mish: x * tanh(softplus(x)). Any shape/dtype."""
    orig_shape = x.shape
    orig_dtype = x.dtype
    n = x.size
    if n == 0:
        return x

    LANE = 128
    itemsize = x.dtype.itemsize
    # Packed-tile sublane multiple: 8 rows for 32-bit, 16 for bf16, 32 for int8/fp8.
    sub_mult = 8 * max(1, 4 // itemsize)

    x_flat = x.reshape(-1)
    n_tail = n % LANE            # <128 ragged elements handled outside the kernel
    n_main = n - n_tail

    main_out = None
    if n_main:
        rows = n_main // LANE
        x2d = x_flat[:n_main].reshape(rows, LANE)  # no-op slice when aligned

        # ~4 MiB (in input dtype) per block; ensure at least 2 grid steps for
        # mid-sized inputs so both v7x TensorCores stream; round rows to the
        # packed sublane tile.
        max_block_rows = max(sub_mult, (4 << 20) // (LANE * itemsize))
        half_rows = (rows + 1) // 2
        block_rows = min(
            max_block_rows,
            ((half_rows + sub_mult - 1) // sub_mult) * sub_mult,
        )
        grid = (pl.cdiv(rows, block_rows),)  # ragged last block masked by Pallas

        cost = pl.CostEstimate(
            flops=10 * n_main,
            transcendentals=2 * n_main,          # exp + reciprocal per element
            bytes_accessed=2 * n_main * itemsize,
        )

        main2d = pl.pallas_call(
            _mish_kernel,
            out_shape=jax.ShapeDtypeStruct((rows, LANE), orig_dtype),
            grid_spec=pltpu.PrefetchScalarGridSpec(
                num_scalar_prefetch=0,
                grid=grid,
                in_specs=[pl.BlockSpec((block_rows, LANE), lambda i: (i, 0))],
                out_specs=pl.BlockSpec((block_rows, LANE), lambda i: (i, 0)),
            ),
            compiler_params=pltpu.CompilerParams(
                # parallel -> grid steps shard across both v7x TensorCores
                dimension_semantics=("parallel",),
                # 16 MiB of double-buffered blocks + elementwise temporaries;
                # covers v5e's 16 MiB scoped default, fits v7x's 64 MiB VMEM.
                vmem_limit_bytes=48 << 20,
            ),
            cost_estimate=cost,
        )(x2d)
        main_out = main2d.reshape(-1)

    if n_tail:
        tail_out = _mish_jnp(x_flat[n_main:])
        out_flat = tail_out if main_out is None else jnp.concatenate([main_out, tail_out])
    else:
        out_flat = main_out

    return out_flat.reshape(orig_shape)


def _mish_ref(x):
    # Pure-JAX reference matching torch: x * tanh(softplus(x)), threshold=20.
    xf = x.astype(jnp.float32)
    sp = jnp.where(xf > 20.0, xf, jnp.log1p(jnp.exp(jnp.minimum(xf, 20.0))))
    return (xf * jnp.tanh(sp)).astype(x.dtype)


if __name__ == "__main__":
    key = jax.random.PRNGKey(0)

    # NCHW input, consistent with the conv-style module this activation lives in.
    x = jax.random.normal(key, (2, 4, 16, 16), dtype=jnp.float32) * 3.0
    y = mish_pallas(x)
    jax.block_until_ready(y)
    y_ref = _mish_ref(x)
    assert y.shape == x.shape and y.dtype == x.dtype
    assert jnp.allclose(y, y_ref, atol=1e-5, rtol=1e-5), "mismatch vs reference"

    # Non-128-aligned shape: exercises the aligned-prefix kernel + jnp tail path.
    x2 = jax.random.normal(jax.random.PRNGKey(1), (9, 115), dtype=jnp.float32) * 3.0
    y2 = mish_pallas(x2)
    jax.block_until_ready(y2)
    assert y2.shape == x2.shape and y2.dtype == x2.dtype
    assert jnp.allclose(y2, _mish_ref(x2), atol=1e-5, rtol=1e-5), "mismatch (unaligned)"

    print("KERNEL_OK")
</pallas_src>

<mosaic_0001>
module attributes {stable_mosaic.version = 11 : i64} {
  func.func @_mish_kernel(%arg0: i32, %arg1: memref<8x128xf32, #tpu.memory_space<vmem>>, %arg2: memref<8x128xf32, #tpu.memory_space<vmem>>) attributes {dimension_semantics = [#tpu.dimension_semantics<parallel>], iteration_bounds = array<i64: 2>, scalar_prefetch = 0 : i64, scratch_operands = 0 : i64, tpu.core_type = #tpu.core_type<tc>, window_params = [{transform_indices = @transform_0, window_bounds = array<i64: 8, 128>}, {transform_indices = @transform_1, window_bounds = array<i64: 8, 128>}]} {
    %c0 = arith.constant 0 : index
    %c0_0 = arith.constant 0 : index
    %0 = vector.load %arg1[%c0, %c0_0] : memref<8x128xf32, #tpu.memory_space<vmem>>, vector<8x128xf32>
    %cst = arith.constant 2.000000e+01 : f32
    %1 = vector.broadcast %cst : f32 to vector<8x128xf32>
    %2 = arith.minimumf %0, %1 : vector<8x128xf32>
    %3 = math.exp %2 : vector<8x128xf32>
    %cst_1 = arith.constant 2.000000e+00 : f32
    %4 = vector.broadcast %cst_1 : f32 to vector<8x128xf32>
    %5 = arith.addf %3, %4 : vector<8x128xf32>
    %6 = arith.mulf %3, %5 : vector<8x128xf32>
    %cst_2 = arith.constant 2.000000e+00 : f32
    %7 = vector.broadcast %cst_2 : f32 to vector<8x128xf32>
    %8 = arith.addf %6, %7 : vector<8x128xf32>
    %9 = arith.mulf %0, %6 : vector<8x128xf32>
    %10 = tpu.reciprocal %8 : vector<8x128xf32> -> vector<8x128xf32>
    %11 = arith.mulf %9, %10 : vector<8x128xf32>
    %cst_3 = arith.constant 2.000000e+01 : f32
    %12 = vector.broadcast %cst_3 : f32 to vector<8x128xf32>
    %13 = arith.cmpf ogt, %0, %12 : vector<8x128xf32>
    %14 = arith.select %13, %0, %11 : vector<8x128xi1>, vector<8x128xf32>
    %c0_4 = arith.constant 0 : index
    %c0_5 = arith.constant 0 : index
    %15 = vector.load %arg2[%c0_4, %c0_5] : memref<8x128xf32, #tpu.memory_space<vmem>>, vector<8x128xf32>
    tpu.vector_store %arg2[%c0_4, %c0_5], %14 {strides = array<i32>} : memref<8x128xf32, #tpu.memory_space<vmem>>, vector<8x128xf32>,
    return
  }
  func.func @transform_0(%arg0: i32) -> (i32, i32) {
    %c0_i32 = arith.constant 0 : i32
    %c0_i32_0 = arith.constant 0 : i32
    return %arg0, %c0_i32 : i32, i32
  }
  func.func @transform_1(%arg0: i32) -> (i32, i32) {
    %c0_i32 = arith.constant 0 : i32
    %c0_i32_0 = arith.constant 0 : i32
    return %arg0, %c0_i32 : i32, i32
  }
}

</mosaic_0001>

<bundles_post_ra>
// kernel: tpu_custom_call.1
= control target key start
LH: loop header
LB: loop body
LE: loop exit
PB: predicated region body
PF: predicated region fallthrough
CT: control target
= control target key end

     0   :  { %6 = vsyncpa [#allocation3], 0  ;;  %s544_s0 = inlined_call_operand.hbm [shape: f32[16,128], index: 0, kind: input, shape index: {}]   ;;  %s545_s1 = inlined_call_operand.hbm [shape: f32[16,128], index: 1, kind: output, shape index: {}]  }
   0x1   :  { %8 = vsyncpa [#allocation3 + $0x1], 0 }
   0x2   :  { %9 = vsyncpa [#allocation4], 0 }
   0x3   :  { %11 = vsyncpa [#allocation4 + $0x1], 0  ;;  %s397_s6 = smov 0   ;;  %s399_s7 = smov 0  }
   0x4   :  { %s401_s8 = smov 0   ;;  %s403_s9 = smov 0  }
   0x5 LB: > { %s418_s10 = sadd.s32 4294967295, %s383_s9   ;;  %s229_s11 = sadd.s32 4294967294, %s383_s9   ;;  %s383_s9 = sphi %s403_s9, %s562_s9   ;;  %s379_s8 = sphi %s401_s8, %s561_s8   ;;  %s375_s7 = sphi %s399_s7, %s560_s7   ;;  %s371_s6 = sphi %s397_s6, %s559_s6  }
   0x6   : > { %s422_s12 = sadd.s32 1, %s383_s9   ;;  %s24_s13 = sadd.s32 1, %s379_s8 }
   0x7   : > { %s21_s14 = ssub.s32 %s383_s9, %s422_s12  ;;  %p31_p0 = scmp.ne.s32.totalorder %s379_s8, %s375_s7 }
   0x8   : > { %p22_p1 = scmp.eq.s32.totalorder %s21_s14, 0  ;;  %p32_p2 = scmp.eq.s32.totalorder %s383_s9, 0 }
   0x9   : > { %p37_p3 = scmp.ne.s32.totalorder %s375_s7, %s371_s6  ;;  %p38_p4 = scmp.eq.s32.totalorder %s418_s10, 0 }
   0xa   : > { %s434_s15 = scalar_select %p22_p1, %s379_s8, %s24_s13  }
   0xb   : > { %p436_p5 = por %p32_p2, %p31_p0  ;;  %p440_p6 = por %p38_p4, %p37_p3 }
   0xc   : > { %p61_p7 = scmp.eq.s32.totalorder %s418_s10, 1  ;;  %p67_p8 = scmp.eq.s32.totalorder %s229_s11, 1 }
   0xd   : > { %s549_s17 = scalar_select %p440_p6, 1, 0 }
   0xe   : > { %p253_p10 = scmp.lt.s32.totalorder %s383_s9, 2  ;;  %p447_p11 = por %p61_p7, %p31_p0 }
   0xf   : > { %p451_p12 = por %p67_p8, %p37_p3  ;;  %s87_s20 = sand.u32 1, %s379_s8  }
  0x10   : > { %s550_s18 = scalar_select %p447_p11, 1, 0 }
  0x11   : > { %s551_s19 = scalar_select %p451_p12, 1, 0 }
  0x12   : > { %s233_s21 = sshll.u32 %s383_s9, 7  ;;  %s232_s22 = sshll.u32 %s87_s20, 3 }
  0x13   : > { %s460_s25 = scalar_lea.hbm %s544_s0, %s233_s21  ;;  %s91_s26 = scalar_lea.vmem [#allocation2], %s232_s22 }
  0x14   : > { %s98_s27 = sshll.u32 %s91_s26, 4  ;;  %p464_p13 = pnand %p253_p10, %p436_p5  ;;  %s468_s27 = int_to_ptr.vmem [resolvable:$true] %s98_s27 }
  0x15   : > { %s88_s29 = scalar_lea.sflag [#allocation3], %s87_s20  ;;  %s291_s30 = scalar_lea.hbm %s460_s25, 128 }
  0x16   : > { %p292_p2 = scmp.ne.s32.totalorder %s460_s25, %s291_s30  ;;  %p293_p3 = pneg %p464_p13 }
  0x17   : > { %s296_s4 = scalar_lea.hbm %s544_s0, 256  ;;  %p297_p5 = scmp.lt.s32.totalorder %s460_s25, %s544_s0 }
  0x18   : > { %p294_p4 = pnand %p293_p3, %p292_p2  ;;  %p298_p8 = scmp.lt.s32.totalorder %s296_s4, %s291_s30 }
  0x1a   : > { %p295_p7 = pneg %p294_p4  ;;  %p299_p10 = por %p298_p8, %p297_p5 }
  0x1c   : > { %p300_p9 = pnand %p299_p10, %p295_p7 }
  0x1e   : > { %303 = shalt.err (!%p300_p9)
}
  0x1f   : > { %s304_s13 = scalar_lea.vmem %s468_s27, 128  ;;  %s385_s14 = smov [#allocation2]  }
  0x20   : > { %p305_p0 = scmp.ne.s32.totalorder %s468_s27, %s304_s13  ;;  %s309_s16 = sshll.u32 %s385_s14, 4  ;;  %s310_s16 = int_to_ptr.vmem [resolvable:$false] %s309_s16 }
  0x21   : > { %s311_s20 = scalar_lea.vmem %s310_s16, 256  ;;  %p312_p4 = scmp.lt.s32.totalorder %s468_s27, %s310_s16 }
  0x22   : > { %p307_p1 = pnand %p305_p0, %p293_p3  ;;  %p313_p12 = scmp.lt.s32.totalorder %s311_s20, %s304_s13 }
  0x24   : > { %p308_p2 = pneg %p307_p1  ;;  %p314_p11 = por %p313_p12, %p312_p4 }
  0x26   : > { %p315_p6 = pnand %p314_p11, %p308_p2 }
  0x28   : > { %318 = shalt.err (!%p315_p6)
}
  0x29   : > { %248 = dma.hbm_to_vmem [thread:$0]  (!%p464_p13), %s460_s25, 128, %s468_s27, %s88_s29  }
  0x2a   : > { %p553_p9 = scmp.lt.s32.totalorder %s383_s9, 3  ;;  %p554_p7 = scmp.ge.s32.totalorder %s383_s9, 1 }
  0x2c   : > { %p104_p0 = pnand %p554_p7, %p553_p9 }
  0x2d   : > { %s495_s21 = sand.u32 (!%p104_p0), 1, %s375_s7   ;;  %p555_p6 = scmp.ne.s32.totalorder (!%p104_p0), %s549_s17, 0 }
  0x2e   : > { %107 = sbr.rel (%p104_p0) target bundleno = 107 (0x6b), region = 24  ;;  %s235_s22 = sshll.u32 (!%p104_p0), %s495_s21, 3 }
  0x2f   : > { %s110_s23 = scalar_lea.sflag (!%p104_p0), [#allocation3], %s495_s21  ;;  %s113_s24 = scalar_lea.vmem (!%p104_p0), [#allocation2], %s235_s22 }
  0x33   : > { %362 = dma.done.wait (%p555_p6), %s110_s23, 128  }
  0x34   : > { %364 = vsyncadd (%p555_p6), %s110_s23, 4294967168  ;;  %v132_v0 = vld [vmem:[%s113_s24] sm:$0xff]  ;;  %s131_s25 = scalar_lea.vmem [#allocation5], %s235_s22  ;;  %s238_s27 = sshll.u32 %s418_s10, 7 }
  0x35   : > { %v133_v1 = vmin.f32 %v132_v0, 20.0  ;;  %s159_s26 = sshll.u32 %s131_s25, 4  ;;  %vm142_vm0 = vcmp.gt.f32.partialorder %v132_v0, 20.0  ;;  %s157_s29 = scalar_lea.hbm %s545_s1, %s238_s27  ;;  %s504_s26 = int_to_ptr.vmem [resolvable:$true] %s159_s26 }
  0x36   : > { %s146_s30 = scalar_lea.sflag [#allocation4], %s495_s21  ;;  %s319_s2 = scalar_lea.vmem %s504_s26, 128 }
  0x37   : > { %v134_v2 = vmul.f32 1.442695, %v133_v1  ;;  %p320_p11 = scmp.ne.s32.totalorder %s504_s26, %s319_s2  ;;  %p556_p12 = scmp.ne.s32.totalorder %s550_s18, 0 }
  0x38   : > { %s386_s10 = smov [#allocation5]  }
  0x39   : > { %287 = vpow2.f32 %v134_v2  ;;  %p321_p13 = pnand %p320_p11, %p556_p12  ;;  %s323_s3 = sshll.u32 %s386_s10, 4  ;;  %s324_s3 = int_to_ptr.vmem [resolvable:$false] %s323_s3 }
  0x3a   : > { %s325_s4 = scalar_lea.vmem %s324_s3, 256  ;;  %p326_p3 = scmp.lt.s32.totalorder %s504_s26, %s324_s3 }
  0x3b   : > { %p322_p1 = pneg %p321_p13  ;;  %p327_p5 = scmp.lt.s32.totalorder %s325_s4, %s319_s2 }
  0x3d   : > { %p328_p8 = por %p327_p5, %p326_p3 }
  0x3f   : > { %p329_p10 = pnand %p328_p8, %p322_p1 }
  0x46   : > { %v288_v3 = vpop.eup %287 }
  0x47   : > { %v136_v4 = vadd.f32 2.0, %v288_v3 }
  0x49   : > { %v137_v5 = vmul.f32 %v288_v3, %v136_v4 }
  0x4b   : > { %v138_v6 = vadd.f32 2.0, %v137_v5  ;;  %v139_v7 = vmul.f32 %v137_v5, %v132_v0 }
  0x4d   : > { %289 = vrcp.f32 %v138_v6 }
  0x5a   : > { %v290_v8 = vpop.eup %289 }
  0x5b   : > { %v141_v9 = vmul.f32 %v290_v8, %v139_v7 }
  0x5d   : > { %v143_v10 = vsel %vm142_vm0, %v132_v0, %v141_v9 }
  0x5e   : > { %144 = vst [vmem:[%s131_s25] sm:$0xff] %v143_v10 }
  0x5f   : > { %332 = shalt.err (!%p329_p10)
}
  0x60   : > { %s333_s5 = scalar_lea.hbm %s157_s29, 128  ;;  %s337_s14 = scalar_lea.hbm %s545_s1, 256 }
  0x61   : > { %p334_p2 = scmp.ne.s32.totalorder %s157_s29, %s333_s5  ;;  %p338_p7 = scmp.lt.s32.totalorder %s157_s29, %s545_s1 }
  0x62   : > { %p339_p0 = scmp.lt.s32.totalorder %s337_s14, %s333_s5 }
  0x63   : > { %p335_p4 = pnand %p334_p2, %p556_p12 }
  0x64   : > { %p340_p6 = por %p339_p0, %p338_p7 }
  0x65   : > { %p336_p9 = pneg %p335_p4 }
  0x67   : > { %p341_p11 = pnand %p340_p6, %p336_p9 }
  0x69   : > { %344 = shalt.err (!%p341_p11)
}
  0x6a   : > { %243 = dma.vmem_to_hbm [thread:$0]  (%p556_p12), %s504_s26, 128, %s157_s29, %s146_s30  }
  0x6b PF: > { %s171_s21 = sand.u32 1, %s371_s6   ;;  %p557_p13 = scmp.ne.s32.totalorder %s551_s19, 0 }
  0x6c   : > { %p558_p1 = scmp.ge.s32.totalorder %s383_s9, 2  ;;  %s172_s22 = scalar_lea.sflag [#allocation4], %s171_s21 }
  0x6e   : > { %p250_p3 = pnand %p558_p1, %p557_p13 }
  0x70   : > { %p251_p5 = pneg %p250_p3 }
  0x72   : > { %366 = dma.done.wait (%p251_p5), %s172_s22, 128  }
  0x73   : > { %368 = vsyncadd (%p251_p5), %s172_s22, 4294967168  ;;  %p14_p8 = scmp.ge.s32.totalorder %s422_s12, 4   ;;  %s559_s6 = smov %s375_s7 }
  0x74   : > { %s560_s7 = smov %s379_s8  ;;  %s561_s8 = smov %s434_s15 }
  0x75   : > { %s562_s9 = smov %s422_s12  ;;  %16 = sbr.rel (!%p14_p8) target bundleno = 5 (0x5), region = 69 }
  0x7a   :  { %177 = vsyncpa [#allocation3], 1 }
  0x7b   :  { %179 = vsyncpa [#allocation3 + $0x1], 1 }
  0x7c   :  { %180 = vsyncpa [#allocation4], 1 }
  0x7d   :  { %182 = vsyncpa [#allocation4 + $0x1], 1 }

</bundles_post_ra>
